<compile_context>
chip_gen: v6e
topology: v6e:2x2x1
jax: 0.10.0
libtpu: 0.0.40
codegen_flags: <defaults>
</compile_context>

<pallas_src>
import jax
import jax.numpy as jnp
from jax import lax
from jax.experimental import pallas as pl
from jax.experimental.pallas import tpu as pltpu


def _round_up(n, m):
    return ((n + m - 1) // m) * m


def _pick_batch_tile(B):
    """Largest batch tile (multiple of 8, <=8192) that evenly divides B,
    capped at B//2 so the grid has >=2 blocks (keeps v7x's 2nd TC busy)."""
    if B < 16:
        return B
    cap = min(8192, B // 2)
    for tb in (8192, 4096, 2048, 1024, 512, 256, 128, 64, 32, 16, 8):
        if tb <= cap and B % tb == 0:
            return tb
    return B  # ragged batch: single full-batch block


def prepare_params(w1, b1, wa, ba, wv, bv):
    """One-time host-side parameter fusion. Do NOT call per forward step.

    Returns a dict of kernel-ready arrays + static dims:
      w1      (S, H)  bf16
      w_heads (H, OUT) bf16   -- [Wa | Wv | 0-pad]
      bias    (2, BW)  f32    -- row0 = b1 (padded), row1 = [ba | bv | 0]
    """
    S, H = w1.shape
    A = wa.shape[1]
    OUT = _round_up(A + 1, 8)          # probs (A lanes) + value (1) + pad
    BW = max(H, OUT)

    w_heads = jnp.concatenate([wa, wv], axis=1)
    w_heads = jnp.pad(w_heads, ((0, 0), (0, OUT - (A + 1))))

    b_heads = jnp.concatenate([ba, bv], axis=1)          # (1, A+1)
    bias = jnp.zeros((2, BW), jnp.float32)
    bias = bias.at[0, :H].set(b1[0].astype(jnp.float32))
    bias = bias.at[1, :A + 1].set(b_heads[0].astype(jnp.float32))

    return dict(
        w1=w1.astype(jnp.bfloat16),
        w_heads=w_heads.astype(jnp.bfloat16),
        bias=bias,
        state_dim=S,
        hidden_dim=H,
        action_dim=A,
        out_width=OUT,
    )


def actor_critic_forward(x, fused):
    """Returns (action_probs (B, A), state_values (B, 1))."""
    B, S = x.shape
    H = fused["hidden_dim"]
    A = fused["action_dim"]
    OUT = fused["out_width"]
    BW = fused["bias"].shape[1]
    assert S == fused["state_dim"]

    TB = _pick_batch_tile(B)
    nb = B // TB

    def kernel(x_ref, w1_ref, wh_ref, b_ref, out_ref):
        # Hot path: 2 bf16 matmuls (MXU, f32 acc), tanh/exp (EUP),
        # row reduce (XLU), selects (VPU).
        xv = x_ref[...]                           # (TB, S) bf16
        bias_rows = b_ref[...]                    # (2, BW) f32
        b1_row = bias_rows[0:1, :H]               # (1, H)
        bh_row = bias_rows[1:2, :OUT]             # (1, OUT)

        h = jnp.tanh(
            jnp.dot(xv, w1_ref[...], preferred_element_type=jnp.float32) + b1_row
        )                                         # (TB, H) f32

        # Fused heads: lanes [0, A) = action logits, lane A = value, rest pad.
        z = jnp.dot(h.astype(jnp.bfloat16), wh_ref[...],
                    preferred_element_type=jnp.float32) + bh_row   # (TB, OUT)

        col = lax.broadcasted_iota(jnp.int32, z.shape, 1)
        is_action = col < A

        # Numerically-stable softmax over the action lanes only (exact divide).
        logits = jnp.where(is_action, z, jnp.float32(-1e30))
        m = jnp.max(logits, axis=-1, keepdims=True)
        e = jnp.where(is_action, jnp.exp(logits - m), 0.0)
        probs = e / jnp.sum(e, axis=-1, keepdims=True)

        # Lane-dense output slab: [probs(0..A-1) | value(A) | zeros].
        out_ref[...] = jnp.where(col == A, z, probs).astype(out_ref.dtype)

    # bf16 cast of the streamed input; inside a jitted PPO step XLA folds this
    # into the producer so the kernel reads half the bytes from HBM.
    out = pl.pallas_call(
        kernel,
        out_shape=jax.ShapeDtypeStruct((B, OUT), jnp.float32),
        grid=(nb,),
        in_specs=[
            pl.BlockSpec((TB, S), lambda i: (i, 0)),    # x: streamed over batch
            pl.BlockSpec((S, H), lambda i: (0, 0)),     # W1: resident
            pl.BlockSpec((H, OUT), lambda i: (0, 0)),   # fused head weight: resident
            pl.BlockSpec((2, BW), lambda i: (0, 0)),    # fused biases: resident
        ],
        out_specs=pl.BlockSpec((TB, OUT), lambda i: (i, 0)),
        compiler_params=pltpu.CompilerParams(
            dimension_semantics=("parallel",),          # batch blocks -> 2 TCs on v7x
        ),
    )(x.astype(jnp.bfloat16), fused["w1"], fused["w_heads"], fused["bias"])

    action_probs = out[:, :A]
    state_values = out[:, A:A + 1]
    return action_probs, state_values


def init_params(key, state_dim, action_dim, hidden_dim=64):
    """Deterministic init mimicking torch.nn.Linear default (U[-1/sqrt(fan_in), +])."""
    ks = jax.random.split(key, 6)

    def uni(k, shape, fan_in):
        bound = 1.0 / jnp.sqrt(jnp.float32(fan_in))
        return jax.random.uniform(k, shape, jnp.float32, -bound, bound)

    w1 = uni(ks[0], (state_dim, hidden_dim), state_dim)
    b1 = uni(ks[1], (1, hidden_dim), state_dim)
    wa = uni(ks[2], (hidden_dim, action_dim), hidden_dim)
    ba = uni(ks[3], (1, action_dim), hidden_dim)
    wv = uni(ks[4], (hidden_dim, 1), hidden_dim)
    bv = uni(ks[5], (1, 1), hidden_dim)
    return w1, b1, wa, ba, wv, bv


def reference_forward(x, w1, b1, wa, ba, wv, bv):
    """Plain-JAX f32 reference of the same forward math."""
    h = jnp.tanh(x @ w1 + b1)
    logits = h @ wa + ba
    probs = jax.nn.softmax(logits, axis=-1)
    values = h @ wv + bv
    return probs, values


if __name__ == "__main__":
    key = jax.random.PRNGKey(0)
    k_params, k_x = jax.random.split(key)

    batch, state_dim, action_dim, hidden_dim = 8, 16, 4, 64

    params = init_params(k_params, state_dim, action_dim, hidden_dim)
    x = jax.random.normal(k_x, (batch, state_dim), dtype=jnp.float32)

    fused = prepare_params(*params)            # one-time parameter fusion
    probs, values = actor_critic_forward(x, fused)
    probs = jax.block_until_ready(probs)
    values = jax.block_until_ready(values)

    # Sanity-check against a plain-JAX f32 reference. Inputs/weights are fed to
    # the MXU in bf16, so compare with a bf16-appropriate tolerance; the softmax
    # normalization itself is exact f32, so the sum-to-1 check stays tight.
    probs_ref, values_ref = reference_forward(x, *params)
    assert probs.shape == (batch, action_dim)
    assert values.shape == (batch, 1)
    assert jnp.allclose(probs, probs_ref, atol=2e-2, rtol=2e-2)
    assert jnp.allclose(values, values_ref, atol=2e-2, rtol=2e-2)
    assert jnp.allclose(jnp.sum(probs, axis=-1), 1.0, atol=1e-5)

    print("KERNEL_OK")
</pallas_src>

<mosaic_0001>
module attributes {stable_mosaic.version = 11 : i64} {
  func.func @kernel(%arg0: i32, %arg1: memref<8x16xbf16, #tpu.memory_space<vmem>>, %arg2: memref<16x64xbf16, #tpu.memory_space<vmem>>, %arg3: memref<64x8xbf16, #tpu.memory_space<vmem>>, %arg4: memref<2x64xf32, #tpu.memory_space<vmem>>, %arg5: memref<8x8xf32, #tpu.memory_space<vmem>>) attributes {dimension_semantics = [#tpu.dimension_semantics<parallel>], iteration_bounds = array<i64: 1>, scalar_prefetch = 0 : i64, scratch_operands = 0 : i64, tpu.core_type = #tpu.core_type<tc>, window_params = [{transform_indices = @transform_0, window_bounds = array<i64: 8, 16>}, {pipeline_mode = #tpu.pipeline_mode<synchronous>, transform_indices = @transform_1, window_bounds = array<i64: 16, 64>}, {pipeline_mode = #tpu.pipeline_mode<synchronous>, transform_indices = @transform_2, window_bounds = array<i64: 64, 8>}, {pipeline_mode = #tpu.pipeline_mode<synchronous>, transform_indices = @transform_3, window_bounds = array<i64: 2, 64>}, {transform_indices = @transform_4, window_bounds = array<i64: 8, 8>}]} {
    %c0 = arith.constant 0 : index
    %c0_0 = arith.constant 0 : index
    %0 = vector.load %arg1[%c0, %c0_0] : memref<8x16xbf16, #tpu.memory_space<vmem>>, vector<8x16xbf16>
    %c0_1 = arith.constant 0 : index
    %c0_2 = arith.constant 0 : index
    %1 = vector.load %arg4[%c0_1, %c0_2] : memref<2x64xf32, #tpu.memory_space<vmem>>, vector<2x64xf32>
    %2 = vector.extract_strided_slice %1 {offsets = [0, 0], sizes = [1, 64], strides = [1, 1]} : vector<2x64xf32> to vector<1x64xf32>
    %3 = vector.extract_strided_slice %1 {offsets = [1, 0], sizes = [1, 8], strides = [1, 1]} : vector<2x64xf32> to vector<1x8xf32>
    %c0_3 = arith.constant 0 : index
    %c0_4 = arith.constant 0 : index
    %4 = vector.load %arg2[%c0_3, %c0_4] : memref<16x64xbf16, #tpu.memory_space<vmem>>, vector<16x64xbf16>
    %cst = arith.constant dense<0.000000e+00> : vector<8x64xf32>
    %5 = tpu.matmul %0, %4, %cst {dimension_numbers = #tpu.dot_dimension_numbers<[1], [0], [0], [1], [0, 0, 1, 1], [], []>} : vector<8x16xbf16>, vector<16x64xbf16>, vector<8x64xf32> -> vector<8x64xf32>
    %6 = vector.broadcast %2 : vector<1x64xf32> to vector<8x64xf32>
    %7 = arith.addf %5, %6 : vector<8x64xf32>
    %8 = math.tanh %7 : vector<8x64xf32>
    %9 = arith.truncf %8 : vector<8x64xf32> to vector<8x64xbf16>
    %c0_5 = arith.constant 0 : index
    %c0_6 = arith.constant 0 : index
    %10 = vector.load %arg3[%c0_5, %c0_6] : memref<64x8xbf16, #tpu.memory_space<vmem>>, vector<64x8xbf16>
    %cst_7 = arith.constant dense<0.000000e+00> : vector<8x8xf32>
    %11 = tpu.matmul %9, %10, %cst_7 {dimension_numbers = #tpu.dot_dimension_numbers<[1], [0], [0], [1], [0, 0, 1, 1], [], []>} : vector<8x64xbf16>, vector<64x8xbf16>, vector<8x8xf32> -> vector<8x8xf32>
    %12 = vector.broadcast %3 : vector<1x8xf32> to vector<8x8xf32>
    %13 = arith.addf %11, %12 : vector<8x8xf32>
    %14 = tpu.iota {dimensions = array<i32: 1>} : vector<8x8xi32>
    %c4_i32 = arith.constant 4 : i32
    %15 = vector.broadcast %c4_i32 : i32 to vector<8x8xi32>
    %16 = arith.cmpi slt, %14, %15 : vector<8x8xi32>
    %cst_8 = arith.constant -1.000000e+30 : f32
    %17 = vector.broadcast %cst_8 : f32 to vector<8x8xf32>
    %18 = arith.select %16, %13, %17 : vector<8x8xi1>, vector<8x8xf32>
    %cst_9 = arith.constant dense<0xFF800000> : vector<8xf32>
    %19 = vector.multi_reduction <maximumf>, %18, %cst_9 [1] : vector<8x8xf32> to vector<8xf32>
    %20 = vector.shape_cast %19 : vector<8xf32> to vector<8x1xf32>
    %21 = vector.broadcast %20 : vector<8x1xf32> to vector<8x8xf32>
    %22 = arith.subf %18, %21 : vector<8x8xf32>
    %23 = math.exp %22 : vector<8x8xf32>
    %cst_10 = arith.constant 0.000000e+00 : f32
    %24 = vector.broadcast %cst_10 : f32 to vector<8x8xf32>
    %25 = arith.select %16, %23, %24 : vector<8x8xi1>, vector<8x8xf32>
    %cst_11 = arith.constant dense<0.000000e+00> : vector<8xf32>
    %26 = vector.multi_reduction <add>, %25, %cst_11 [1] : vector<8x8xf32> to vector<8xf32>
    %27 = vector.shape_cast %26 : vector<8xf32> to vector<8x1xf32>
    %28 = vector.broadcast %27 : vector<8x1xf32> to vector<8x8xf32>
    %29 = arith.divf %25, %28 : vector<8x8xf32>
    %c4_i32_12 = arith.constant 4 : i32
    %30 = vector.broadcast %c4_i32_12 : i32 to vector<8x8xi32>
    %31 = arith.cmpi eq, %14, %30 : vector<8x8xi32>
    %32 = arith.select %31, %13, %29 : vector<8x8xi1>, vector<8x8xf32>
    %c0_13 = arith.constant 0 : index
    %c0_14 = arith.constant 0 : index
    %33 = vector.load %arg5[%c0_13, %c0_14] : memref<8x8xf32, #tpu.memory_space<vmem>>, vector<8x8xf32>
    tpu.vector_store %arg5[%c0_13, %c0_14], %32 {strides = array<i32>} : memref<8x8xf32, #tpu.memory_space<vmem>>, vector<8x8xf32>,
    return
  }
  func.func @transform_0(%arg0: i32) -> (i32, i32) {
    %c0_i32 = arith.constant 0 : i32
    %c0_i32_0 = arith.constant 0 : i32
    return %arg0, %c0_i32 : i32, i32
  }
  func.func @transform_1(%arg0: i32) -> (i32, i32) {
    %c0_i32 = arith.constant 0 : i32
    %c0_i32_0 = arith.constant 0 : i32
    %c0_i32_1 = arith.constant 0 : i32
    return %c0_i32, %c0_i32_0 : i32, i32
  }
  func.func @transform_2(%arg0: i32) -> (i32, i32) {
    %c0_i32 = arith.constant 0 : i32
    %c0_i32_0 = arith.constant 0 : i32
    %c0_i32_1 = arith.constant 0 : i32
    return %c0_i32, %c0_i32_0 : i32, i32
  }
  func.func @transform_3(%arg0: i32) -> (i32, i32) {
    %c0_i32 = arith.constant 0 : i32
    %c0_i32_0 = arith.constant 0 : i32
    %c0_i32_1 = arith.constant 0 : i32
    return %c0_i32, %c0_i32_0 : i32, i32
  }
  func.func @transform_4(%arg0: i32) -> (i32, i32) {
    %c0_i32 = arith.constant 0 : i32
    %c0_i32_0 = arith.constant 0 : i32
    return %arg0, %c0_i32 : i32, i32
  }
}

</mosaic_0001>

<bundles_post_ra>
// kernel: tpu_custom_call.1
= control target key start
LH: loop header
LB: loop body
LE: loop exit
PB: predicated region body
PF: predicated region fallthrough
CT: control target
= control target key end

     0   :  { %v261_v1 = vmov 0.0   ;;  %vm262_vm0 = vmmov 0   ;;  %vm33_vm1 = vcmask 130048   ;;  %s316_s0 = inlined_call_operand.vmem [shape: bf16[8,16], index: 0, kind: input, shape index: {}]   ;;  %s317_s1 = inlined_call_operand.vmem [shape: bf16[16,64], index: 1, kind: input, shape index: {}]   ;;  %s318_s2 = inlined_call_operand.vmem [shape: bf16[64,8], index: 2, kind: input, shape index: {}]   ;;  %s319_s3 = inlined_call_operand.vmem [shape: f32[2,64], index: 3, kind: input, shape index: {}]   ;;  %s320_s4 = inlined_call_operand.hbm [shape: f32[8,8], index: 4, kind: output, shape index: {}]  }
   0x1   :  { %v228_v0 = vld [vmem:[%s317_s1] sm:$0xff]   ;;  %207 = vmatprep.subr.bf16.mxu0 %v261_v1  ;;  %213 = vmatprep.subr.bf16.mxu1 %v261_v1 }
   0x2   :  { %v19_v2 = vld [vmem:[%s316_s0] sm:$0xf]  ;;  %208 = vmatpush3.bf16.msra.mxu0 %v228_v0  ;;  %209 = vmatprep.mubr.msk.bf16.mxu0 %vm262_vm0, %v261_v1 }
   0x3   :  { %221 = vmatprep.mubr.msk.bf16.mxu1 %vm262_vm0, %v261_v1 }
   0x5   :  { %210 = vmatmul.mubr.msk.bf16.vlgmr.msra.gmra.mxu0 %vm33_vm1, %v19_v2 }
   0x6   :  { %9 = vsyncpa [#allocation3], 0  ;;  %v229_v3 = vld [vmem:[%s318_s2 + $0x18] sm:$0xff]   ;;  %v230_v4 = vld [vmem:[%s318_s2 + $0x10] sm:$0xff]   ;;  %v23_v7 = vlaneseq  ;;  %vm115_vm2 = vcmask 523264   ;;  %vm163_vm4 = vcmask 64512  }
   0x7   :  { %214 = vmatpush3.bf16.msra.mxu1 %v229_v3  ;;  %v231_v5 = vld [vmem:[%s318_s2 + $0x8] sm:$0xff]   ;;  %v232_v6 = vld [vmem:[%s318_s2] sm:$0xff]   ;;  %s263_s2 = smov [#allocation2]  }
   0x8   :  { %215 = vmatprep.subr.bf16.mxu1 %v261_v1  ;;  %v24_v8 = vshrl.u32 %v23_v7, 7  ;;  %v20_v10 = vld [vmem:[%s319_s3] sm:$0x3]  ;;  %v160_v20 = vand.u32 127, %v23_v7  ;;  %s185_s3 = sshll.u32 %s263_s2, 4  ;;  %s186_s3 = int_to_ptr.vmem [resolvable:$true] %s185_s3 }
   0x9   :  { %s239_s27 = scalar_lea.vmem %s186_s3, 128  ;;  %p244_p1 = scmp.lt.s32.totalorder %s186_s3, %s186_s3 }
   0xa   :  { %v25_v9 = vsub.s32 0, %v24_v8  ;;  %v89_v19 = vsub.s32 1, %v24_v8  ;;  %vm161_vm3 = vcmp.lt.s32.totalorder %v160_v20, 4  ;;  %vm176_vm5 = vcmp.eq.s32.totalorder %v160_v20, 4  ;;  %p240_p0 = scmp.ne.s32.totalorder %s186_s3, %s239_s27  ;;  %p245_p2 = scmp.lt.s32.totalorder %s239_s27, %s239_s27 }
   0xb   :  { %216 = vmatpush3.bf16.msra.mxu1 %v230_v4 }
   0xc   :  { %217 = vmatprep.subr.bf16.mxu1 %v261_v1  ;;  %v26_v11 = vrot.slane %v20_v10, %v25_v9  ;;  %v90_v21 = vrot.slane %v20_v10, %v89_v19  ;;  %p246_p3 = por %p245_p2, %p244_p1 }
   0xe   :  { %p247_p4 = pnand %p246_p3, %p240_p0 }
   0xf   :  { %218 = vmatpush3.bf16.msra.mxu1 %v231_v5 }
  0x10   :  { %219 = vmatprep.subr.bf16.mxu1 %v261_v1 }
  0x13   :  { %220 = vmatpush3.bf16.msra.mxu1 %v232_v6 }
  0xc5   :  { %v71_v12 = vpop.f32.mrf.mxu0 }
  0xc6   :  { %v72_v13 = vadd.f32 %v71_v12, %v26_v11 }
  0xc7   :  { %v211_v14 = vpop.f32.mrf.mxu0 }
  0xc8   :  { %233 = vtanh.f32 %v72_v13 }
  0xc9   :  { %v74_v15 = vpop.f32.mrf.mxu0 }
  0xcb   :  { %v212_v16 = vpop.f32.mrf.mxu0 }
  0xd5   :  { %v234_v17 = vpop.eup %233 }
  0xd6   :  { %v78_v18 = vpack.c.bf16 %v234_v17, %v234_v17 }
  0xd8   :  { %222 = vmatmul.mubr.msk.bf16.vlgmr.msra.gmra.mxu1 %vm115_vm2, %v78_v18 }
 0x198   :  { %v153_v22 = vpop.f32.mrf.mxu1 }
 0x199   :  { %v154_v23 = vadd.f32 %v153_v22, %v90_v21 }
 0x19a   :  { %v223_v24 = vpop.f32.mrf.mxu1 }
 0x19b   :  { %v162_v25 = vsel %vm161_vm3, %v154_v23, -1e+30 }
 0x19c   :  { %v156_v26 = vpop.f32.mrf.mxu1  ;;  %v164_v27 = vsel %vm163_vm4, %v162_v25, -inf }
 0x19d   :  { %165 = vmax.xlane.f32.xlu0 %v164_v27 }
 0x19e   :  { %v224_v28 = vpop.f32.mrf.mxu1 }
 0x226   :  { %v166_v29 = vpop.xlane.xlu0 %165 }
 0x227   :  { %v167_v30 = vsub.f32 %v162_v25, %v166_v29 }
 0x229   :  { %v168_v31 = vmul.f32 1.442695, %v167_v30 }
 0x22b   :  { %235 = vpow2.f32 %v168_v31 }
 0x238   :  { %v236_v32 = vpop.eup %235 }
 0x239   :  { %v170_v33 = vsel %vm161_vm3, %v236_v32, 0.0 }
 0x23a   :  { %v171_v34 = vsel %vm163_vm4, %v170_v33, 0.0 }
 0x23b   :  { %172 = vadd.xlane.f32.xlu0 %v171_v34 }
 0x2c4   :  { %v173_v35 = vpop.xlane.xlu0 %172 }
 0x2c5   :  { %237 = vrcp.f32 %v173_v35 }
 0x2d2   :  { %v238_v36 = vpop.eup %237 }
 0x2d3   :  { %v175_v37 = vmul.f32 %v238_v36, %v170_v33 }
 0x2d5   :  { %v177_v38 = vsel %vm176_vm5, %v154_v23, %v175_v37 }
 0x2d6   :  { %178 = vst.msk [vmem:[#allocation2] sm:$0xff] %vm163_vm4, %v177_v38 }
 0x2d7   :  { %250 = shalt.err (!%p247_p4)
}
 0x2d8   :  { %188 = dma.vmem_to_hbm [thread:$0]  %s186_s3, 128, %s320_s4, [#allocation3]  }
 0x2d9   :  { %259 = dma.done.wait [#allocation3], 128  }
 0x2da   :  { %260 = vsyncadd [#allocation3], 4294967168 }
 0x2db   :  { %192 = vsyncpa [#allocation3], 1 }

</bundles_post_ra>
